<compile_context>
chip_gen: v7x
topology: tpu7x:2x2x1
jax: 0.10.0
libtpu: 0.0.40
codegen_flags: <defaults>
</compile_context>

<pallas_src>
import math
import functools

import jax
import jax.numpy as jnp
from jax import lax
from jax.experimental import pallas as pl
from jax.experimental.pallas import tpu as pltpu


# ----------------------------------------------------------------------------
# helpers
# ----------------------------------------------------------------------------
def _round_up(x, n):
    return ((x + n - 1) // n) * n


def _sublane_granule(dtype):
    # f32 -> 8 rows, bf16 -> 16, int8/fp8 -> 32 (sub-32-bit packs along sublanes)
    return {4: 8, 2: 16, 1: 32}.get(jnp.dtype(dtype).itemsize, 8)


def _pick_seq_tile(T, granule, max_rows):
    """Largest granule-multiple divisor of T that is <= max_rows (else T)."""
    max_rows = max(granule, (max_rows // granule) * granule)
    if T <= max_rows:
        return T
    best = None
    t = granule
    while t <= max_rows:
        if T % t == 0:
            best = t
        t += granule
    # TODO(synk): T with no granule-multiple divisor <= the budget falls back
    # to a full-length tile (may exceed the VMEM estimate for huge ragged T).
    return best if best is not None else T


# ----------------------------------------------------------------------------
# kernels
# ----------------------------------------------------------------------------
def _kv_stats_kernel(k_ref, v_ref, mask_ref, w_ref, bias_ref, kps_ref, kptv_ref):
    """Per grid step:
         k/v_ref  : (1, t_tile, Dp)   mask_ref : (1, t_tile, 1)
         w_ref    : (Dp, Mp)          bias_ref : (1, Mp) f32
         kps_ref  : (1, 1, Mp)  f32 output, accumulated across the seq axis
         kptv_ref : (1, Mp, Dp) f32 output, accumulated across the seq axis
    """
    @pl.when(pl.program_id(1) == 0)
    def _init():
        kps_ref[...] = jnp.zeros_like(kps_ref)
        kptv_ref[...] = jnp.zeros_like(kptv_ref)

    mask = mask_ref[0]                             # (t, 1), input dtype
    k = k_ref[0] * mask                            # (t, Dp), input dtype (no upcast)
    v = v_ref[0] * mask                            # (t, Dp)

    kf = k.astype(jnp.float32)
    kd = 0.5 * jnp.sum(kf * kf, axis=-1, keepdims=True)                   # (t, 1)
    kwtx = jnp.dot(k, w_ref[...], preferred_element_type=jnp.float32)     # (t, Mp)
    # bias = log(1/sqrt(m)) on real feature columns, -1e30 (exp -> 0) on pads.
    kp = jnp.exp(kwtx - kd + bias_ref[...])                               # (t, Mp) f32

    kps_ref[0] += jnp.sum(kp, axis=0, keepdims=True)                      # (1, Mp)
    # kp^T @ V: contract the sequence-tile axis; operands in the input dtype.
    kptv_ref[0] += lax.dot_general(kp.astype(v.dtype), v,
                                   (((0,), (0,)), ((), ())),
                                   preferred_element_type=jnp.float32)    # (Mp, Dp)


def _q_emit_kernel(q_ref, kps_ref, kptv_ref, w_ref, bias_ref, o_ref, *, eps):
    """Per grid step:
         q_ref    : (1, t_tile, Dp)    kps_ref  : (1, 1, Mp) f32
         kptv_ref : (1, Mp, Dp) f32    w_ref    : (Dp, Mp)   bias_ref: (1, Mp)
         o_ref    : (1, t_tile, Dp) f32
    """
    q = q_ref[0]                                                           # (t, Dp)
    qf = q.astype(jnp.float32)
    qd = 0.5 * jnp.sum(qf * qf, axis=-1, keepdims=True)                    # (t, 1)
    qwtx = jnp.dot(q, w_ref[...], preferred_element_type=jnp.float32)      # (t, Mp)
    qp = jnp.exp(qwtx - qd + bias_ref[...])                                # (t, Mp) f32

    d = jnp.sum(qp * kps_ref[0], axis=-1, keepdims=True)                   # (t, 1)
    y = jnp.dot(qp, kptv_ref[0], preferred_element_type=jnp.float32)       # (t, Dp)

    # Reference divides by (D + eps) twice -> one reciprocal, two multiplies.
    inv = pl.reciprocal(d + eps)
    # TODO(synk): nn.Dropout(drop_attn) on the output is identity in eval / p=0;
    # no stochastic dropout is applied here.
    o_ref[0] = (y * (inv * inv)).astype(o_ref.dtype)


# ----------------------------------------------------------------------------
# wrapper
# ----------------------------------------------------------------------------
def performer_attention(Q, K, V, w, *, key_padding_mask=None, epsilon=1e-8):
    """Q, K, V: [B, T, D]; w: [M, D] random-feature matrix. Returns [B, T, D] f32."""
    B, T, D = Q.shape
    M = w.shape[0]
    in_dtype = jnp.dtype(Q.dtype)
    itemsize = in_dtype.itemsize

    m_pad = _round_up(M, 128)     # lane-dense random-feature dim
    d_pad = _round_up(D, 128)     # lane-dense model dim (sliced off at the end)

    # Transposed, zero-padded projection, kept in the input dtype for the MXU.
    w_t = jnp.zeros((d_pad, m_pad), jnp.float32)
    w_t = w_t.at[:D, :M].set(jnp.asarray(w, jnp.float32).T).astype(in_dtype)

    # Additive exp bias: log(1/sqrt(m)) for real columns; -1e30 -> exp == 0 for pads.
    bias = jnp.full((1, m_pad), -1e30, jnp.float32)
    bias = bias.at[0, :M].set(-0.5 * math.log(M))

    if key_padding_mask is None:
        mask = jnp.ones((B, T, 1), in_dtype)
    else:
        mask = jnp.asarray(key_padding_mask, in_dtype).reshape(B, T, 1)

    if d_pad != D:
        pad = ((0, 0), (0, 0), (0, d_pad - D))
        Qp, Kp, Vp = jnp.pad(Q, pad), jnp.pad(K, pad), jnp.pad(V, pad)
    else:
        Qp, Kp, Vp = Q, K, V

    # --- generation-aware VMEM budget drives tile size and vmem_limit -------
    try:
        vmem_cap = int(pltpu.get_tpu_info().vmem_capacity_bytes)
    except Exception:
        vmem_cap = 64 << 20                       # conservative (v7x per-core)
    budget = int(0.85 * vmem_cap)

    granule = _sublane_granule(in_dtype)
    fixed = (2 * d_pad * m_pad * itemsize              # w_t (double-buffered)
             + 2 * m_pad * 4                           # exp bias
             + 2 * (m_pad * 4 + m_pad * d_pad * 4))    # kp_sum / kptv blocks
    per_row = max(2 * (2 * d_pad * itemsize + itemsize),   # kernel 1: K, V, mask
                  2 * (d_pad * itemsize + d_pad * 4))      # kernel 2: Q + f32 out
    avail = budget - fixed - (4 << 20)
    max_rows = max(granule, avail // per_row)
    t_tile = _pick_seq_tile(T, granule, min(max_rows, 1024))
    n_t = T // t_tile

    est = fixed + per_row * t_tile + (2 << 20)
    vmem_limit = min(budget, max(int(1.3 * est) + (8 << 20), 32 << 20))

    seq_map = lambda b, j: (b, j, 0)
    stat_map = lambda b, j: (b, 0, 0)
    const_map = lambda b, j: (0, 0)

    # ---- kernel 1: per-batch KV statistics ----------------------------------
    kp_sum, kptv = pl.pallas_call(
        _kv_stats_kernel,
        out_shape=(jax.ShapeDtypeStruct((B, 1, m_pad), jnp.float32),
                   jax.ShapeDtypeStruct((B, m_pad, d_pad), jnp.float32)),
        grid_spec=pltpu.PrefetchScalarGridSpec(
            num_scalar_prefetch=0,
            grid=(B, n_t),
            in_specs=[
                pl.BlockSpec((1, t_tile, d_pad), seq_map),     # K
                pl.BlockSpec((1, t_tile, d_pad), seq_map),     # V
                pl.BlockSpec((1, t_tile, 1), seq_map),         # key-padding mask
                pl.BlockSpec((d_pad, m_pad), const_map),       # w_t (resident)
                pl.BlockSpec((1, m_pad), const_map),           # exp bias
            ],
            out_specs=[
                pl.BlockSpec((1, 1, m_pad), stat_map),         # kp_sum accumulator
                pl.BlockSpec((1, m_pad, d_pad), stat_map),     # kp^T @ V accumulator
            ]),
        compiler_params=pltpu.CompilerParams(
            dimension_semantics=("parallel", "arbitrary"),
            vmem_limit_bytes=vmem_limit),
    )(Kp, Vp, mask, w_t, bias)

    # ---- kernel 2: Q feature map + output (fully parallel grid) -------------
    y = pl.pallas_call(
        functools.partial(_q_emit_kernel, eps=float(epsilon)),
        out_shape=jax.ShapeDtypeStruct((B, T, d_pad), jnp.float32),
        grid_spec=pltpu.PrefetchScalarGridSpec(
            num_scalar_prefetch=0,
            grid=(B, n_t),
            in_specs=[
                pl.BlockSpec((1, t_tile, d_pad), seq_map),     # Q
                pl.BlockSpec((1, 1, m_pad), stat_map),         # kp_sum
                pl.BlockSpec((1, m_pad, d_pad), stat_map),     # kptv
                pl.BlockSpec((d_pad, m_pad), const_map),       # w_t (resident)
                pl.BlockSpec((1, m_pad), const_map),           # exp bias
            ],
            out_specs=pl.BlockSpec((1, t_tile, d_pad), seq_map)),
        compiler_params=pltpu.CompilerParams(
            dimension_semantics=("parallel", "parallel"),
            vmem_limit_bytes=vmem_limit),
    )(Qp, kp_sum, kptv, w_t, bias)

    return y if d_pad == D else y[..., :D]


# ----------------------------------------------------------------------------
# pure-JAX reference (high-precision einsums) and test harness
# ----------------------------------------------------------------------------
def _reference(Q, K, V, w, epsilon=1e-8):
    m = w.shape[0]
    hp = lax.Precision.HIGHEST

    def prm_exp(x):
        xd = jnp.sum(x * x, axis=-1, keepdims=True) / 2.0
        wtx = jnp.einsum('bti,mi->btm', x.astype(jnp.float32), w, precision=hp)
        return jnp.exp(wtx - xd) / math.sqrt(m)

    kp, qp = prm_exp(K), prm_exp(Q)
    D_ = jnp.einsum('bti,bi->bt', qp, kp.sum(axis=1), precision=hp)[:, :, None]
    kptv = jnp.einsum('bin,bim->bnm', V.astype(jnp.float32), kp, precision=hp)
    y = jnp.einsum('bti,bni->btn', qp, kptv, precision=hp) / (D_ + epsilon)
    y = y / (D_ + epsilon)
    return y


def _make_orthogonal_w(key, m, dim):
    """Deterministic stand-in for nn.init.orthogonal_(randn(m, dim)) * sqrt(m)."""
    a = jax.random.normal(key, (dim, m), dtype=jnp.float32)
    q, _ = jnp.linalg.qr(a)          # (dim, m) orthonormal columns
    return q.T * math.sqrt(m)        # (m, dim) orthonormal rows, scaled


if __name__ == "__main__":
    num_heads, head_dim = 2, 16
    dim = num_heads * head_dim        # 32
    m = int(dim * 0.5)                # 16
    B, T = 2, 8

    root = jax.random.PRNGKey(0)
    kq, kk, kv, kw, km = jax.random.split(root, 5)
    # Moderate Q/K scale keeps exp(wtx - |x|^2/2) and the denominator D well
    # conditioned, so the TPU-vs-reference comparison is meaningful.
    Q = 0.25 * jax.random.normal(kq, (B, T, dim), dtype=jnp.float32)
    K = 0.25 * jax.random.normal(kk, (B, T, dim), dtype=jnp.float32)
    V = jax.random.normal(kv, (B, T, dim), dtype=jnp.float32)
    w = _make_orthogonal_w(kw, m, dim)

    # Unmasked path.
    y = jax.block_until_ready(performer_attention(Q, K, V, w))
    y_ref = _reference(Q, K, V, w)
    assert y.shape == (B, T, dim)
    err = float(jnp.max(jnp.abs(y - y_ref)))
    assert jnp.allclose(y, y_ref, atol=3e-3, rtol=8e-2), \
        f"mismatch vs reference (max abs err {err:.3e})"

    # key_padding_mask path (mask folded inside kernel 1).
    kpm = (jax.random.uniform(km, (B, T)) > 0.3).astype(jnp.float32)
    y_m = jax.block_until_ready(
        performer_attention(Q, K, V, w, key_padding_mask=kpm))
    y_m_ref = _reference(Q, K * kpm[:, :, None], V * kpm[:, :, None], w)
    err_m = float(jnp.max(jnp.abs(y_m - y_m_ref)))
    assert jnp.allclose(y_m, y_m_ref, atol=3e-3, rtol=8e-2), \
        f"mismatch vs reference with mask (max abs err {err_m:.3e})"

    print("KERNEL_OK")
</pallas_src>

<mosaic_0001>
module attributes {stable_mosaic.version = 11 : i64} {
  func.func @_kv_stats_kernel(%arg0: i32, %arg1: i32, %arg2: memref<1x8x128xf32, #tpu.memory_space<vmem>>, %arg3: memref<1x8x128xf32, #tpu.memory_space<vmem>>, %arg4: memref<1x8x1xf32, #tpu.memory_space<vmem>>, %arg5: memref<128x128xf32, #tpu.memory_space<vmem>>, %arg6: memref<1x128xf32, #tpu.memory_space<vmem>>, %arg7: memref<1x1x128xf32, #tpu.memory_space<vmem>>, %arg8: memref<1x128x128xf32, #tpu.memory_space<vmem>>) attributes {dimension_semantics = [#tpu.dimension_semantics<parallel>, #tpu.dimension_semantics<arbitrary>], iteration_bounds = array<i64: 2, 1>, scalar_prefetch = 0 : i64, scratch_operands = 0 : i64, tpu.core_type = #tpu.core_type<tc>, window_params = [{transform_indices = @transform_0, window_bounds = array<i64: 1, 8, 128>}, {transform_indices = @transform_1, window_bounds = array<i64: 1, 8, 128>}, {transform_indices = @transform_2, window_bounds = array<i64: 1, 8, 1>}, {pipeline_mode = #tpu.pipeline_mode<synchronous>, transform_indices = @transform_3, window_bounds = array<i64: 128, 128>}, {pipeline_mode = #tpu.pipeline_mode<synchronous>, transform_indices = @transform_4, window_bounds = array<i64: 1, 128>}, {transform_indices = @transform_5, window_bounds = array<i64: 1, 1, 128>}, {transform_indices = @transform_6, window_bounds = array<i64: 1, 128, 128>}]} {
    %c0_i32 = arith.constant 0 : i32
    %0 = arith.cmpi eq, %arg1, %c0_i32 : i32
    %1 = arith.extui %0 : i1 to i32
    %c0_i32_0 = arith.constant 0 : i32
    %2 = arith.cmpi ne, %1, %c0_i32_0 : i32
    scf.if %2 {
      %cst_29 = arith.constant 0.000000e+00 : f32
      %41 = vector.broadcast %cst_29 : f32 to vector<1x1x128xf32>
      %c0_30 = arith.constant 0 : index
      %c0_31 = arith.constant 0 : index
      %c0_32 = arith.constant 0 : index
      %42 = vector.load %arg7[%c0_30, %c0_31, %c0_32] : memref<1x1x128xf32, #tpu.memory_space<vmem>>, vector<1x1x128xf32>
      tpu.vector_store %arg7[%c0_30, %c0_31, %c0_32], %41 {strides = array<i32>} : memref<1x1x128xf32, #tpu.memory_space<vmem>>, vector<1x1x128xf32>,
      %cst_33 = arith.constant 0.000000e+00 : f32
      %43 = vector.broadcast %cst_33 : f32 to vector<1x128x128xf32>
      %c0_34 = arith.constant 0 : index
      %c0_35 = arith.constant 0 : index
      %c0_36 = arith.constant 0 : index
      %44 = vector.load %arg8[%c0_34, %c0_35, %c0_36] : memref<1x128x128xf32, #tpu.memory_space<vmem>>, vector<1x128x128xf32>
      tpu.vector_store %arg8[%c0_34, %c0_35, %c0_36], %43 {strides = array<i32>} : memref<1x128x128xf32, #tpu.memory_space<vmem>>, vector<1x128x128xf32>,
    } else {
    }
    %c0 = arith.constant 0 : index
    %c0_1 = arith.constant 0 : index
    %c0_2 = arith.constant 0 : index
    %3 = vector.load %arg4[%c0, %c0_1, %c0_2] : memref<1x8x1xf32, #tpu.memory_space<vmem>>, vector<1x8x1xf32>
    %4 = vector.shape_cast %3 : vector<1x8x1xf32> to vector<8x1xf32>
    %c0_3 = arith.constant 0 : index
    %c0_4 = arith.constant 0 : index
    %c0_5 = arith.constant 0 : index
    %5 = vector.load %arg2[%c0_3, %c0_4, %c0_5] : memref<1x8x128xf32, #tpu.memory_space<vmem>>, vector<1x8x128xf32>
    %6 = vector.shape_cast %5 : vector<1x8x128xf32> to vector<8x128xf32>
    %7 = vector.broadcast %4 : vector<8x1xf32> to vector<8x128xf32>
    %8 = arith.mulf %6, %7 : vector<8x128xf32>
    %c0_6 = arith.constant 0 : index
    %c0_7 = arith.constant 0 : index
    %c0_8 = arith.constant 0 : index
    %9 = vector.load %arg3[%c0_6, %c0_7, %c0_8] : memref<1x8x128xf32, #tpu.memory_space<vmem>>, vector<1x8x128xf32>
    %10 = vector.shape_cast %9 : vector<1x8x128xf32> to vector<8x128xf32>
    %11 = vector.broadcast %4 : vector<8x1xf32> to vector<8x128xf32>
    %12 = arith.mulf %10, %11 : vector<8x128xf32>
    %13 = arith.mulf %8, %8 : vector<8x128xf32>
    %cst = arith.constant dense<0.000000e+00> : vector<8xf32>
    %14 = vector.multi_reduction <add>, %13, %cst [1] : vector<8x128xf32> to vector<8xf32>
    %15 = vector.shape_cast %14 : vector<8xf32> to vector<8x1xf32>
    %cst_9 = arith.constant 5.000000e-01 : f32
    %16 = vector.broadcast %cst_9 : f32 to vector<8x1xf32>
    %17 = arith.mulf %16, %15 : vector<8x1xf32>
    %c0_10 = arith.constant 0 : index
    %c0_11 = arith.constant 0 : index
    %18 = vector.load %arg5[%c0_10, %c0_11] : memref<128x128xf32, #tpu.memory_space<vmem>>, vector<128x128xf32>
    %cst_12 = arith.constant dense<0.000000e+00> : vector<8x128xf32>
    %19 = tpu.matmul %8, %18, %cst_12 {dimension_numbers = #tpu.dot_dimension_numbers<[1], [0], [0], [1], [0, 0, 1, 1], [], []>} : vector<8x128xf32>, vector<128x128xf32>, vector<8x128xf32> -> vector<8x128xf32>
    %20 = vector.broadcast %17 : vector<8x1xf32> to vector<8x128xf32>
    %21 = arith.subf %19, %20 : vector<8x128xf32>
    %c0_13 = arith.constant 0 : index
    %c0_14 = arith.constant 0 : index
    %22 = vector.load %arg6[%c0_13, %c0_14] : memref<1x128xf32, #tpu.memory_space<vmem>>, vector<1x128xf32>
    %23 = vector.broadcast %22 : vector<1x128xf32> to vector<8x128xf32>
    %24 = arith.addf %21, %23 : vector<8x128xf32>
    %25 = math.exp %24 : vector<8x128xf32>
    %c0_15 = arith.constant 0 : index
    %c0_16 = arith.constant 0 : index
    %c0_17 = arith.constant 0 : index
    %26 = vector.load %arg7[%c0_15, %c0_16, %c0_17] : memref<1x1x128xf32, #tpu.memory_space<vmem>>, vector<1x1x128xf32>
    %27 = vector.shape_cast %26 : vector<1x1x128xf32> to vector<1x128xf32>
    %cst_18 = arith.constant dense<0.000000e+00> : vector<128xf32>
    %28 = vector.multi_reduction <add>, %25, %cst_18 [0] : vector<8x128xf32> to vector<128xf32>
    %29 = vector.shape_cast %28 : vector<128xf32> to vector<1x128xf32>
    %30 = arith.addf %27, %29 : vector<1x128xf32>
    %c0_19 = arith.constant 0 : index
    %c0_20 = arith.constant 0 : index
    %c0_21 = arith.constant 0 : index
    %31 = vector.load %arg7[%c0_19, %c0_20, %c0_21] : memref<1x1x128xf32, #tpu.memory_space<vmem>>, vector<1x1x128xf32>
    %32 = vector.shape_cast %31 : vector<1x1x128xf32> to vector<1x128xf32>
    %33 = vector.shape_cast %30 : vector<1x128xf32> to vector<1x1x128xf32>
    tpu.vector_store %arg7[%c0_19, %c0_20, %c0_21], %33 {strides = array<i32>} : memref<1x1x128xf32, #tpu.memory_space<vmem>>, vector<1x1x128xf32>,
    %c0_22 = arith.constant 0 : index
    %c0_23 = arith.constant 0 : index
    %c0_24 = arith.constant 0 : index
    %34 = vector.load %arg8[%c0_22, %c0_23, %c0_24] : memref<1x128x128xf32, #tpu.memory_space<vmem>>, vector<1x128x128xf32>
    %35 = vector.shape_cast %34 : vector<1x128x128xf32> to vector<128x128xf32>
    %cst_25 = arith.constant dense<0.000000e+00> : vector<128x128xf32>
    %36 = tpu.matmul %25, %12, %cst_25 {dimension_numbers = #tpu.dot_dimension_numbers<[0], [0], [1], [1], [0, 1, 1, 1], [], []>} : vector<8x128xf32>, vector<8x128xf32>, vector<128x128xf32> -> vector<128x128xf32>
    %37 = arith.addf %35, %36 : vector<128x128xf32>
    %c0_26 = arith.constant 0 : index
    %c0_27 = arith.constant 0 : index
    %c0_28 = arith.constant 0 : index
    %38 = vector.load %arg8[%c0_26, %c0_27, %c0_28] : memref<1x128x128xf32, #tpu.memory_space<vmem>>, vector<1x128x128xf32>
    %39 = vector.shape_cast %38 : vector<1x128x128xf32> to vector<128x128xf32>
    %40 = vector.shape_cast %37 : vector<128x128xf32> to vector<1x128x128xf32>
    tpu.vector_store %arg8[%c0_26, %c0_27, %c0_28], %40 {strides = array<i32>} : memref<1x128x128xf32, #tpu.memory_space<vmem>>, vector<1x128x128xf32>,
    return
  }
  func.func @transform_0(%arg0: i32, %arg1: i32) -> (i32, i32, i32) {
    %c0_i32 = arith.constant 0 : i32
    %c0_i32_0 = arith.constant 0 : i32
    return %arg0, %arg1, %c0_i32 : i32, i32, i32
  }
  func.func @transform_1(%arg0: i32, %arg1: i32) -> (i32, i32, i32) {
    %c0_i32 = arith.constant 0 : i32
    %c0_i32_0 = arith.constant 0 : i32
    return %arg0, %arg1, %c0_i32 : i32, i32, i32
  }
  func.func @transform_2(%arg0: i32, %arg1: i32) -> (i32, i32, i32) {
    %c0_i32 = arith.constant 0 : i32
    %c0_i32_0 = arith.constant 0 : i32
    return %arg0, %arg1, %c0_i32 : i32, i32, i32
  }
  func.func @transform_3(%arg0: i32, %arg1: i32) -> (i32, i32) {
    %c0_i32 = arith.constant 0 : i32
    %c0_i32_0 = arith.constant 0 : i32
    %c0_i32_1 = arith.constant 0 : i32
    return %c0_i32, %c0_i32_0 : i32, i32
  }
  func.func @transform_4(%arg0: i32, %arg1: i32) -> (i32, i32) {
    %c0_i32 = arith.constant 0 : i32
    %c0_i32_0 = arith.constant 0 : i32
    %c0_i32_1 = arith.constant 0 : i32
    return %c0_i32, %c0_i32_0 : i32, i32
  }
  func.func @transform_5(%arg0: i32, %arg1: i32) -> (i32, i32, i32) {
    %c0_i32 = arith.constant 0 : i32
    %c0_i32_0 = arith.constant 0 : i32
    %c0_i32_1 = arith.constant 0 : i32
    return %arg0, %c0_i32, %c0_i32_0 : i32, i32, i32
  }
  func.func @transform_6(%arg0: i32, %arg1: i32) -> (i32, i32, i32) {
    %c0_i32 = arith.constant 0 : i32
    %c0_i32_0 = arith.constant 0 : i32
    %c0_i32_1 = arith.constant 0 : i32
    return %arg0, %c0_i32, %c0_i32_0 : i32, i32, i32
  }
}

</mosaic_0001>

<bundles_post_ra>
// kernel: tpu_custom_call.1
= control target key start
LH: loop header
LB: loop body
LE: loop exit
PB: predicated region body
PF: predicated region fallthrough
CT: control target
= control target key end

     0   :  { %s1733_s0 = inlined_call_operand.vmem [shape: f32[2,8,128], index: 0, kind: input, shape index: {}]   ;;  %s1734_s1 = inlined_call_operand.hbm [shape: f32[2,8,128], index: 1, kind: input, shape index: {}]   ;;  %s1735_s2 = inlined_call_operand.vmem [shape: f32[2,8,1], index: 2, kind: input, shape index: {}]   ;;  %s1736_s3 = inlined_call_operand.hbm [shape: f32[128,128], index: 3, kind: input, shape index: {}]   ;;  %s1737_s4 = inlined_call_operand.vmem [shape: f32[1,128], index: 4, kind: input, shape index: {}]   ;;  %s1738_s5 = inlined_call_operand.hbm [shape: f32[2,1,128], index: 5, kind: output, shape index: {0}]   ;;  %s1739_s6 = inlined_call_operand.hbm [shape: f32[2,128,128], index: 6, kind: output, shape index: {1}]  }
   0x1   :  { %1744 = sst [smem:[#allocation14_spill]] %s1736_s3 }
   0x2   :  { %12 = vsyncpa [#allocation3], 0 }
   0x3   :  { %14 = vsyncpa [#allocation3 + $0x1], 0 }
   0x4   :  { %15 = vsyncpa [#allocation6], 0 }
   0x5   :  { %16 = vsyncpa [#allocation4], 0 }
   0x6   :  { %18 = vsyncpa [#allocation4 + $0x1], 0 }
   0x7   :  { %19 = vsyncpa [#allocation9], 0 }
   0x8   :  { %21 = vsyncpa [#allocation9 + $0x1], 0  ;;  %s1429_s21 = smov 0   ;;  %s1431_s22 = smov 0  }
   0x9   :  { %s1433_s23 = smov 0   ;;  %s1435_s24 = smov 0  }
   0xa   :  { %s1437_s25 = smov 0   ;;  %s1439_s26 = smov 0  }
   0xb LB: > { %s959_s27 = sadd.s32 4294967295, %s1380_s26   ;;  %s960_s28 = sadd.s32 4294967294, %s1380_s26   ;;  %s1380_s26 = sphi %s1439_s26, %s27_s26   ;;  %s1376_s25 = sphi %s1437_s25, %s1765_s25   ;;  %s1372_s24 = sphi %s1435_s24, %s1764_s24   ;;  %s1368_s23 = sphi %s1433_s23, %s1763_s23   ;;  %s1364_s22 = sphi %s1431_s22, %s1762_s22   ;;  %s1360_s21 = sphi %s1429_s21, %s1761_s21  }
   0xc   : > { %p89_p0 = scmp.ne.s32.totalorder %s1364_s22, %s1360_s21  ;;  %p1463_p1 = scmp.eq.s32.totalorder %s959_s27, 0 }
   0xd   : > { %p1467_p2 = scmp.eq.s32.totalorder %s959_s27, 1  ;;  %p189_p3 = scmp.eq.s32.totalorder %s960_s28, 1 }
   0xe   : > { %s1745_s29 = scalar_select %p1463_p1, 1, 0 }
   0xf   : > { %s1746_s30 = scalar_select %p1467_p2, 1, 0 }
  0x10   : > { %p1473_p4 = por %p1463_p1, %p89_p0  ;;  %p961_p5 = scmp.ge.s32.totalorder %s1380_s26, 1 }
  0x11   : > { %p1478_p6 = por %p189_p3, %p89_p0  ;;  %p222_p7 = scmp.lt.s32.totalorder %s1380_s26, 3 }
  0x12   : > { %s1747_s7 = scalar_select %p1473_p4, 1, 0 }
  0x13   : > { %s1748_s8 = scalar_select %p1478_p6, 1, 0 }
  0x14   : > { %p1483_p8 = pnand %p961_p5, %p222_p7  ;;  %s1382_s10 = smov [#allocation5]  }
  0x15   : > { %s234_s11 = sshll.u32 %s1382_s10, 4  ;;  %s39_s13 = sadd.s32 1, %s1376_s25  ;;  %s235_s11 = int_to_ptr.vmem [resolvable:$true] %s234_s11 }
  0x16   : > { %s1749_s9 = scalar_select %p1483_p8, 1, 0 }
  0x17   : > { %p1125_p9 = pneg %p1483_p8  ;;  %s1751_s3 = sld [smem:[#allocation14_spill]] }
  0x19   : > { %p1492_p11 = pnand %p1125_p9, %p1463_p1 }
  0x1b   : > { %p1206_p13 = pneg %p1492_p11 }
  0x1d   : > { %s1204_s16 = scalar_lea.hbm %s1751_s3, 2048 }
  0x1e   : > { %p1205_p12 = scmp.ne.s32.totalorder %s1751_s3, %s1204_s16  ;;  %p1211_p5 = scmp.lt.u32.totalorder %s1204_s16, %s1751_s3 }
  0x20   : > { %p1207_p0 = pnand %p1206_p13, %p1205_p12 }
  0x22   : > { %p1208_p3 = pneg %p1207_p0 }
  0x24   : > { %p1213_p7 = pnand %p1211_p5, %p1208_p3 }
  0x26   : > { %1216 = shalt.err (!%p1213_p7)
}
  0x27   : > { %s1217_s27 = scalar_lea.vmem %s235_s11, 2048  ;;  %p1225_p1 = scmp.lt.s32.totalorder %s235_s11, %s235_s11 }
  0x28   : > { %p1218_p9 = scmp.ne.s32.totalorder %s235_s11, %s1217_s27  ;;  %p1226_p4 = scmp.lt.s32.totalorder %s1217_s27, %s1217_s27 }
  0x2a   : > { %p1220_p10 = pnand %p1218_p9, %p1206_p13  ;;  %p1227_p8 = por %p1226_p4, %p1225_p1 }
  0x2c   : > { %p1221_p6 = pneg %p1220_p10 }
  0x2e   : > { %p1228_p2 = pnand %p1227_p8, %p1221_p6 }
  0x30   : > { %1231 = shalt.err (!%p1228_p2)
}
  0x31   : > { %s1383_s28 = smov 128   ;;  %s1384_s10 = smov 8  }
  0x32   : > { %1128 = dma.hbm_to_vmem [thread:$0]  (!%p1492_p11), %s1751_s3, 2048, %s235_s11, [#allocation6], %s1383_s28, %s1383_s28, %s1384_s10  }
  0x33   : > { %p41_p1 = scmp.ge.s32.totalorder %s39_s13, 2  ;;  %s76_s16 = sadd.s32 1, %s1368_s23 }
  0x34   : > { %p83_p2 = scmp.ne.s32.totalorder %s1368_s23, %s1364_s22  ;;  %p84_p4 = scmp.eq.s32.totalorder %s1380_s26, 0 }
  0x35   : > { %s1767_s13 = smov (%p41_p1, %s39_s13), 0  ;;  %p1753_p8 = scmp.ne.s32.totalorder %s1746_s30, 0 }
  0x36   : > { %p1519_p6 = por %p84_p4, %p83_p2  ;;  %s71_s12 = ssub.s32 %s1376_s25, %s1767_s13 }
  0x37   : > { %p1525_p10 = por %p1753_p8, %p83_p2  ;;  %p1141_p12 = scmp.lt.s32.totalorder %s1380_s26, 2 }
  0x38   : > { %p74_p11 = scmp.eq.s32.totalorder %s71_s12, 0  ;;  %s261_s11 = sand.u32 1, %s1368_s23  }
  0x39   : > { %s964_s19 = sshll.u32 %s261_s11, 3  ;;  %s965_s27 = sshll.u32 %s1376_s25, 7 }
  0x3a   : > { %s1534_s20 = scalar_select %p74_p11, %s1368_s23, %s76_s16  }
  0x3b   : > { %s1540_s14 = scalar_lea.hbm %s1734_s1, %s965_s27  ;;  %s265_s30 = scalar_lea.vmem [#allocation2], %s964_s19 }
  0x3c   : > { %s273_s15 = sshll.u32 %s265_s30, 4  ;;  %p1546_p13 = pnand %p1141_p12, %p1519_p6  ;;  %s1542_s15 = int_to_ptr.vmem [resolvable:$true] %s273_s15 }
  0x3d   : > { %s262_s16 = scalar_lea.sflag [#allocation3], %s261_s11  ;;  %s1232_s3 = scalar_lea.hbm %s1540_s14, 128 }
  0x3e   : > { %p1233_p0 = scmp.ne.s32.totalorder %s1540_s14, %s1232_s3  ;;  %p1234_p3 = pneg %p1546_p13 }
  0x3f   : > { %s1237_s28 = scalar_lea.hbm %s1734_s1, 256  ;;  %p1238_p9 = scmp.lt.u32.totalorder %s1540_s14, %s1734_s1 }
  0x40   : > { %p1235_p5 = pnand %p1234_p3, %p1233_p0  ;;  %p1239_p1 = scmp.lt.u32.totalorder %s1237_s28, %s1232_s3 }
  0x41   : > { %p1241_p4 = scmp.lt.u32.totalorder %s1232_s3, %s1540_s14 }
  0x42   : > { %p1236_p7 = pneg %p1235_p5  ;;  %p1240_p2 = por %p1239_p1, %p1238_p9 }
  0x44   : > { %p1242_p6 = por %p1241_p4, %p1240_p2 }
  0x46   : > { %p1243_p8 = pnand %p1242_p6, %p1236_p7 }
  0x48   : > { %1246 = shalt.err (!%p1243_p8)
}
  0x49   : > { %s1247_s11 = scalar_lea.vmem %s1542_s15, 128  ;;  %s1385_s30 = smov [#allocation2]  }
  0x4a   : > { %p1248_p12 = scmp.ne.s32.totalorder %s1542_s15, %s1247_s11  ;;  %s1252_s19 = sshll.u32 %s1385_s30, 4  ;;  %s1253_s19 = int_to_ptr.vmem [resolvable:$false] %s1252_s19 }
  0x4b   : > { %s1254_s27 = scalar_lea.vmem %s1253_s19, 256  ;;  %p1255_p5 = scmp.lt.s32.totalorder %s1542_s15, %s1253_s19 }
  0x4c   : > { %p1250_p11 = pnand %p1248_p12, %p1234_p3  ;;  %p1256_p9 = scmp.lt.s32.totalorder %s1254_s27, %s1247_s11 }
  0x4e   : > { %p1251_p0 = pneg %p1250_p11  ;;  %p1257_p1 = por %p1256_p9, %p1255_p5 }
  0x50   : > { %p1258_p2 = pnand %p1257_p1, %p1251_p0 }
  0x52   : > { %1261 = shalt.err (!%p1258_p2)
}
  0x53   : > { %1132 = dma.hbm_to_vmem [thread:$0]  (!%p1546_p13), %s1540_s14, 128, %s1542_s15, %s262_s16  }
  0x54   : > { %p1756_p7 = scmp.ne.s32.totalorder %s1749_s9, 0 }
  0x55   : > { %s1578_s3 = sand.u32 (!%p1756_p7), 1, %s1364_s22   ;;  %p1757_p3 = scmp.ne.s32.totalorder (!%p1756_p7), %s1747_s7, 0 }
  0x56   : > { %292 = sbr.rel (%p1756_p7) target bundleno = 880 (0x370), region = 40  ;;  %s967_s28 = sshll.u32 (!%p1756_p7), %s1578_s3, 3 }
  0x57   : > { %s295_s17 = scalar_lea.sflag (!%p1756_p7), [#allocation3], %s1578_s3  ;;  %s1582_s10 = scalar_lea.vmem (!%p1756_p7), [#allocation2], %s967_s28 }
  0x5d   : > { %1343 = dma.done.wait (%p1757_p3), %s295_s17, 128  }
  0x5e   : > { %1345 = vsyncadd (%p1757_p3), %s295_s17, 4294967168  ;;  %p1758_p13 = scmp.ne.s32.totalorder %s1745_s29, 0 }
  0x60   : > { %1347 = dma.done.wait (%p1758_p13), [#allocation6], 2048  }
  0x61   : > { %1349 = vsyncadd (%p1758_p13), [#allocation6], 4294965248  ;;  %p349_p4 = scmp.lt.s32.totalorder %s1372_s24, 1  ;;  %v1386_v0 = vmov 0   ;;  %v1387_v1 = vmov 0.0|0.0   ;;  %v398_v3 = vld [vmem:[#allocation5] sm:$0xff] }
  0x62   : > { %1201 = vset.pattern.permute.xlu0 %v1386_v0  ;;  %1091 = vmatprep.subr.bf16.mxu0 %v1387_v1  ;;  %v399_v4 = vld [vmem:[#allocation5 + $0x8] sm:$0xff]  ;;  %v400_v6 = vld [vmem:[#allocation5 + $0x10] sm:$0xff]  ;;  %v401_v7 = vld [vmem:[#allocation5 + $0x18] sm:$0xff]  ;;  %vm1388_vm0 = vmmov 0   ;;  %v1389_v8 = vmov 0.0   ;;  %s1609_s30 = scalar_lea.vmem [#allocation7], %s1578_s3 }
  0x63   : > { %s1594_s9 = scalar_select %p349_p4, %s1372_s24, 1  ;;  %v1092_v5 = vpack.c.bf16 %v399_v4, %v398_v3  ;;  %1062 = vmatprep.mubr.msk.f32.mxu0 %vm1388_vm0, %v1389_v8  ;;  %v1095_v9 = vpack.c.bf16 %v401_v7, %v400_v6  ;;  %v402_v10 = vld [vmem:[#allocation5 + $0x20] sm:$0xff]  ;;  %v403_v11 = vld [vmem:[#allocation5 + $0x28] sm:$0xff]  ;;  %v404_v13 = vld [vmem:[#allocation5 + $0x30] sm:$0xff]  ;;  %367 = vst [vmem:[%s1609_s30] sm:$0x1] %v1389_v8  ;;  %vm552_vm1 = vcmask 64512  }
  0x64   : > { %v1098_v12 = vpack.c.bf16 %v403_v11, %v402_v10  ;;  %v405_v14 = vld [vmem:[#allocation5 + $0x38] sm:$0xff]  ;;  %v406_v16 = vld [vmem:[#allocation5 + $0x40] sm:$0xff]  ;;  %v407_v17 = vld [vmem:[#allocation5 + $0x48] sm:$0xff]  ;;  %s990_s28 = sshll.u32 %s1372_s24, 4  ;;  %s796_s17 = sshll.u32 %s1609_s30, 4  ;;  %s797_s17 = int_to_ptr.vmem [resolvable:$true] %s796_s17 }
  0x65   : > { %s970_s14 = sshll.u32 %s1594_s9, 3  ;;  %1093 = vmatpush3.bf16.msra.mxu0 %v1092_v5  ;;  %v1101_v15 = vpack.c.bf16 %v405_v14, %v404_v13  ;;  %v1104_v18 = vpack.c.bf16 %v407_v17, %v406_v16  ;;  %v408_v19 = vld [vmem:[#allocation5 + $0x50] sm:$0xff]  ;;  %v409_v20 = vld [vmem:[#allocation5 + $0x58] sm:$0xff]  ;;  %v410_v22 = vld [vmem:[#allocation5 + $0x60] sm:$0xff]  ;;  %s779_s7 = scalar_lea.sflag [#allocation4], %s1578_s3 }
  0x66   : > { %s362_s12 = scalar_lea.vmem %s1735_s2, %s970_s14  ;;  %1094 = vmatprep.subr.bf16.mxu0 %v1387_v1  ;;  %v1107_v21 = vpack.c.bf16 %v409_v20, %v408_v19  ;;  %v411_v23 = vld [vmem:[#allocation5 + $0x68] sm:$0xff]  ;;  %v412_v25 = vld [vmem:[#allocation5 + $0x70] sm:$0xff]  ;;  %v413_v26 = vld [vmem:[#allocation5 + $0x78] sm:$0xff]  ;;  %s355_s11 = scalar_lea.vmem %s1733_s0, %s970_s14 }
  0x67   : > { %v384_v2 = vld [vmem:[%s362_s12] sm:$0xff]  ;;  %v1110_v24 = vpack.c.bf16 %v411_v23, %v410_v22  ;;  %v1113_v27 = vpack.c.bf16 %v413_v26, %v412_v25  ;;  %s1638_s14 = scalar_lea.hbm %s1738_s5, %s990_s28  ;;  %s1262_s15 = scalar_lea.vmem %s797_s17, 16 }
  0x68   : > { %388 = vperm.xlu0 %1201, %v384_v2   ;;  %v385_v28 = vld [vmem:[%s355_s11] sm:$0xff]  ;;  %p1263_p6 = scmp.ne.s32.totalorder %s797_s17, %s1262_s15  ;;  %s1390_s12 = smov [#allocation7]  }
  0x69   : > { %1096 = vmatpush3.bf16.msra.mxu0 %v1095_v9  ;;  %v392_v29 = vld [vmem:[%s1582_s10] sm:$0xff]  ;;  %s1266_s29 = sshll.u32 %s1390_s12, 4  ;;  %s1267_s29 = int_to_ptr.vmem [resolvable:$false] %s1266_s29 }
  0x6a   : > { %1097 = vmatprep.subr.bf16.mxu0 %v1387_v1  ;;  %v972_v37 = vld [vmem:[%s1737_s4] ss:$0 sm:$0xff]  ;;  %p1264_p8 = pnand %p1263_p6, %p1525_p10  ;;  %s1268_s16 = scalar_lea.vmem %s1267_s29, 32 }
  0x6b   : > { %v495_v48 = vld [vmem:[%s1609_s30] sm:$0x1]  ;;  %p1269_p11 = scmp.lt.s32.totalorder %s797_s17, %s1267_s29  ;;  %p1270_p0 = scmp.lt.s32.totalorder %s1268_s16, %s1262_s15 }
  0x6c   : > { %p1265_p12 = pneg %p1264_p8 }
  0x6d   : > { %1099 = vmatpush3.bf16.msra.mxu0 %v1098_v12  ;;  %p1271_p5 = por %p1270_p0, %p1269_p11 }
  0x6e   : > { %1100 = vmatprep.subr.bf16.mxu0 %v1387_v1 }
  0x6f   : > { %p1272_p9 = pnand %p1271_p5, %p1265_p12 }
  0x71   : > { %1102 = vmatpush3.bf16.msra.mxu0 %v1101_v15 }
  0x72   : > { %1103 = vmatprep.subr.bf16.mxu0 %v1387_v1 }
  0x75   : > { %1105 = vmatpush3.bf16.msra.mxu0 %v1104_v18 }
  0x76   : > { %1106 = vmatprep.subr.bf16.mxu0 %v1387_v1 }
  0x79   : > { %1108 = vmatpush3.bf16.msra.mxu0 %v1107_v21 }
  0x7a   : > { %1109 = vmatprep.subr.bf16.mxu0 %v1387_v1 }
  0x7d   : > { %1111 = vmatpush3.bf16.msra.mxu0 %v1110_v24 }
  0x7e   : > { %1112 = vmatprep.subr.bf16.mxu0 %v1387_v1 }
  0x81   : > { %1114 = vmatpush3.bf16.msra.mxu0 %v1113_v27 }
  0xe7   : > { %v389_v30 = vpop.permute.xlu0 %388 }
  0xe8   : > { %v391_v31 = vmul.f32 %v389_v30, %v385_v28  ;;  %v393_v32 = vmul.f32 %v392_v29, %v389_v30 }
  0xea   : > { %1063 = vmatmul.mubr.f32.vlgmr.msra.gmra.mrb[0].mxu0 %v391_v31  ;;  %1065 = vmatprep.subr.mxu1 %v393_v32  ;;  %v394_v33 = vmul.f32 %v391_v31, %v391_v31 }
  0xeb   : > { %1066 = vmatpush3.msra.mxu1 %v393_v32 }
  0xec   : > { %395 = vadd.xlane.f32.xlu0 %v394_v33 }
 0x179   : > { %v396_v34 = vpop.xlane.xlu0 %395 }
 0x17a   : > { %v397_v35 = vmul.f32 0.5, %v396_v34 }
 0x1bd   : > { %v480_v36 = vpop.f32.mrb[0].mxu0 }
 0x1be   : > { %v484_v38 = vsub.f32 %v480_v36, %v397_v35  ;;  %v1064_v39 = vpop.f32.mrb[1].mxu0 }
 0x1c0   : > { %v492_v40 = vadd.f32 %v972_v37, %v484_v38 }
 0x1c2   : > { %v493_v41 = vmul.f32 1.442695, %v492_v40 }
 0x1c4   : > { %1202 = vpow2.f32 %v493_v41 }
 0x1ce   : > { %v1203_v42 = vpop.eup %1202 }
 0x1cf   : > { %520 = vxpose.xlu1.b32.start.end [1/1] (short) %v1203_v42, 128  ;;  %v496_v43 = vrot.slane %v1203_v42, 4 }
 0x1d1   : > { %v497_v44 = vadd.f32 %v1203_v42, %v496_v43 }
 0x1d3   : > { %v498_v45 = vrot.slane %v497_v44, 2 }
 0x1d5   : > { %v499_v46 = vadd.f32 %v498_v45, %v497_v44 }
 0x1d7   : > { %v500_v47 = vrot.slane %v499_v46, 1 }
 0x1d9   : > { %v501_v49 = vadd.f32 %v500_v47, %v499_v46 }
 0x1db   : > { %v502_v50 = vadd.f32 %v501_v49, %v495_v48 }
 0x1dd   : > { %503 = vst [vmem:[%s1609_s30] sm:$0x1] %v502_v50 }
 0x24f   : > { %v536_v51 = vpop.trf.xlu1 }
 0x250   : > { %1067 = vmatprep.mubr.msk.f32.mxu1 %vm552_vm1, %v536_v51 }
 0x253   : > { %v537_v52 = vpop.trf.xlu1 }
 0x254   : > { %1068 = vmatmul.mubr.msk.f32.vlgmr.msra.gmra.mrb[0].mxu1 %vm552_vm1, %v537_v52 }
 0x257   : > { %v538_v53 = vpop.trf.xlu1 }
 0x258   : > { %1070 = vmatprep.mubr.msk.f32.mxu1 %vm552_vm1, %v538_v53 }
 0x25b   : > { %v539_v54 = vpop.trf.xlu1 }
 0x25c   : > { %1071 = vmatmul.mubr.msk.f32.gmra.mrb[2].mxu1 %vm552_vm1, %v539_v54 }
 0x25f   : > { %v540_v55 = vpop.trf.xlu1 }
 0x260   : > { %1073 = vmatprep.mubr.msk.f32.mxu1 %vm552_vm1, %v540_v55 }
 0x263   : > { %v541_v56 = vpop.trf.xlu1 }
 0x264   : > { %1074 = vmatmul.mubr.msk.f32.gmra.mrb[4].mxu1 %vm552_vm1, %v541_v56 }
 0x267   : > { %v542_v57 = vpop.trf.xlu1 }
 0x268   : > { %1076 = vmatprep.mubr.msk.f32.mxu1 %vm552_vm1, %v542_v57 }
 0x26b   : > { %v543_v58 = vpop.trf.xlu1 }
 0x26c   : > { %1077 = vmatmul.mubr.msk.f32.gmra.mrb[6].mxu1 %vm552_vm1, %v543_v58 }
 0x26f   : > { %v544_v59 = vpop.trf.xlu1 }
 0x270   : > { %1079 = vmatprep.mubr.msk.f32.mxu1 %vm552_vm1, %v544_v59 }
 0x273   : > { %v545_v60 = vpop.trf.xlu1 }
 0x274   : > { %1080 = vmatmul.mubr.msk.f32.gmra.mrb[8].mxu1 %vm552_vm1, %v545_v60 }
 0x277   : > { %v546_v61 = vpop.trf.xlu1 }
 0x278   : > { %1082 = vmatprep.mubr.msk.f32.mxu1 %vm552_vm1, %v546_v61 }
 0x27b   : > { %v547_v62 = vpop.trf.xlu1 }
 0x27c   : > { %1083 = vmatmul.mubr.msk.f32.gmra.mrb[10].mxu1 %vm552_vm1, %v547_v62 }
 0x27f   : > { %v548_v63 = vpop.trf.xlu1 }
 0x280   : > { %1085 = vmatprep.mubr.msk.f32.mxu1 %vm552_vm1, %v548_v63 }
 0x283   : > { %v549_v0 = vpop.trf.xlu1 }
 0x284   : > { %1086 = vmatmul.mubr.msk.f32.gmra.mrb[12].mxu1 %vm552_vm1, %v549_v0 }
 0x287   : > { %v550_v1 = vpop.trf.xlu1 }
 0x288   : > { %1088 = vmatprep.mubr.msk.f32.mxu1 %vm552_vm1, %v550_v1 }
 0x28b   : > { %v551_v2 = vpop.trf.xlu1 }
 0x28c   : > { %1089 = vmatmul.mubr.msk.f32.gmra.mrb[14].mxu1 %vm552_vm1, %v551_v2 }
 0x28d   : > { %1275 = shalt.err (!%p1272_p9)
}
 0x28e   : > { %s1276_s11 = scalar_lea.hbm %s1638_s14, 16  ;;  %s1280_s27 = scalar_lea.hbm %s1738_s5, 32 }
 0x28f   : > { %p1277_p1 = scmp.ne.s32.totalorder %s1638_s14, %s1276_s11  ;;  %p1281_p3 = scmp.lt.u32.totalorder %s1638_s14, %s1738_s5 }
 0x290   : > { %p1282_p13 = scmp.lt.u32.totalorder %s1280_s27, %s1276_s11  ;;  %p1284_p6 = scmp.lt.u32.totalorder %s1276_s11, %s1638_s14 }
 0x291   : > { %p1278_p2 = pnand %p1277_p1, %p1525_p10 }
 0x292   : > { %p1283_p4 = por %p1282_p13, %p1281_p3 }
 0x293   : > { %p1279_p7 = pneg %p1278_p2 }
 0x294   : > { %p1285_p8 = por %p1284_p6, %p1283_p4 }
 0x296   : > { %p1286_p12 = pnand %p1285_p8, %p1279_p7 }
 0x298   : > { %1289 = shalt.err (!%p1286_p12)
}
 0x299   : > { %1121 = dma.vmem_to_hbm [thread:$0]  (%p1525_p10), %s797_s17, 16, %s1638_s14, %s779_s7  }
 0x29a   : > { %s969_s9 = sshll.u32 %s1578_s3, 7  ;;  %s995_s17 = sshll.u32 %s1372_s24, 11 }
 0x29b   : > { %s1659_s15 = scalar_lea.vmem [#allocation8], %s969_s9  ;;  %s1680_s29 = scalar_lea.hbm %s1739_s6, %s995_s17 }
 0x29c   : > { %s809_s14 = sshll.u32 %s1659_s15, 4  ;;  %s783_s16 = scalar_lea.sflag [#allocation9], %s1578_s3  ;;  %s1682_s14 = int_to_ptr.vmem [resolvable:$true] %s809_s14 }
 0x29d   : > { %s1290_s11 = scalar_lea.vmem %s1682_s14, 2048  ;;  %s1391_s24 = smov [#allocation8]  }
 0x29e   : > { %p1291_p11 = scmp.ne.s32.totalorder %s1682_s14, %s1290_s11  ;;  %s1294_s30 = sshll.u32 %s1391_s24, 4  ;;  %s1295_s30 = int_to_ptr.vmem [resolvable:$false] %s1294_s30 }
 0x29f   : > { %s1296_s19 = scalar_lea.vmem %s1295_s30, 4096  ;;  %p1297_p9 = scmp.lt.s32.totalorder %s1682_s14, %s1295_s30 }
 0x2a0   : > { %p1292_p0 = pnand %p1291_p11, %p1525_p10  ;;  %p1298_p1 = scmp.lt.s32.totalorder %s1296_s19, %s1290_s11 }
 0x2a2   : > { %p1293_p5 = pneg %p1292_p0  ;;  %p1299_p2 = por %p1298_p1, %p1297_p9 }
 0x2a4   : > { %p1300_p7 = pnand %p1299_p2, %p1293_p5 }
 0x327   : > { %v1069_v3 = vpop.f32.mrb[0].mxu1 }
 0x328   : > { %v667_v4 = vpop.f32.mrb[1].mxu1  ;;  %763 = vst [vmem:[%s1659_s15 + $0x8] sm:$0xff] %v1069_v3 }
 0x329   : > { %762 = vst [vmem:[%s1659_s15] sm:$0xff] %v667_v4 }
 0x32f   : > { %v1072_v5 = vpop.f32.mrb[2].mxu1 }
 0x330   : > { %v677_v6 = vpop.f32.mrb[3].mxu1  ;;  %765 = vst [vmem:[%s1659_s15 + $0x18] sm:$0xff] %v1072_v5 }
 0x331   : > { %764 = vst [vmem:[%s1659_s15 + $0x10] sm:$0xff] %v677_v6 }
 0x337   : > { %v1075_v7 = vpop.f32.mrb[4].mxu1 }
 0x338   : > { %v687_v8 = vpop.f32.mrb[5].mxu1  ;;  %767 = vst [vmem:[%s1659_s15 + $0x28] sm:$0xff] %v1075_v7 }
 0x339   : > { %766 = vst [vmem:[%s1659_s15 + $0x20] sm:$0xff] %v687_v8 }
 0x33f   : > { %v1078_v9 = vpop.f32.mrb[6].mxu1 }
 0x340   : > { %v697_v10 = vpop.f32.mrb[7].mxu1  ;;  %769 = vst [vmem:[%s1659_s15 + $0x38] sm:$0xff] %v1078_v9 }
 0x341   : > { %768 = vst [vmem:[%s1659_s15 + $0x30] sm:$0xff] %v697_v10 }
 0x347   : > { %v1081_v11 = vpop.f32.mrb[8].mxu1 }
 0x348   : > { %v707_v12 = vpop.f32.mrb[9].mxu1  ;;  %771 = vst [vmem:[%s1659_s15 + $0x48] sm:$0xff] %v1081_v11 }
 0x349   : > { %770 = vst [vmem:[%s1659_s15 + $0x40] sm:$0xff] %v707_v12 }
 0x34f   : > { %v1084_v13 = vpop.f32.mrb[10].mxu1 }
 0x350   : > { %v717_v14 = vpop.f32.mrb[11].mxu1  ;;  %773 = vst [vmem:[%s1659_s15 + $0x58] sm:$0xff] %v1084_v13 }
 0x351   : > { %772 = vst [vmem:[%s1659_s15 + $0x50] sm:$0xff] %v717_v14 }
 0x357   : > { %v1087_v15 = vpop.f32.mrb[12].mxu1 }
 0x358   : > { %v727_v16 = vpop.f32.mrb[13].mxu1  ;;  %775 = vst [vmem:[%s1659_s15 + $0x68] sm:$0xff] %v1087_v15 }
 0x359   : > { %774 = vst [vmem:[%s1659_s15 + $0x60] sm:$0xff] %v727_v16 }
 0x35f   : > { %v1090_v17 = vpop.f32.mrb[14].mxu1 }
 0x360   : > { %v737_v18 = vpop.f32.mrb[15].mxu1  ;;  %777 = vst [vmem:[%s1659_s15 + $0x78] sm:$0xff] %v1090_v17 }
 0x361   : > { %776 = vst [vmem:[%s1659_s15 + $0x70] sm:$0xff] %v737_v18 }
 0x362   : > { %1303 = shalt.err (!%p1300_p7)
}
 0x363   : > { %s1304_s27 = scalar_lea.hbm %s1680_s29, 2048  ;;  %s1308_s9 = scalar_lea.hbm %s1739_s6, 4096 }
 0x364   : > { %p1305_p3 = scmp.ne.s32.totalorder %s1680_s29, %s1304_s27  ;;  %p1309_p6 = scmp.lt.u32.totalorder %s1680_s29, %s1739_s6 }
 0x365   : > { %p1310_p8 = scmp.lt.u32.totalorder %s1308_s9, %s1304_s27  ;;  %p1312_p11 = scmp.lt.u32.totalorder %s1304_s27, %s1680_s29 }
 0x366   : > { %p1306_p13 = pnand %p1305_p3, %p1525_p10 }
 0x367   : > { %p1311_p12 = por %p1310_p8, %p1309_p6 }
 0x368   : > { %p1307_p4 = pneg %p1306_p13 }
 0x369   : > { %p1313_p0 = por %p1312_p11, %p1311_p12 }
 0x36b   : > { %p1314_p5 = pnand %p1313_p0, %p1307_p4 }
 0x36d   : > { %1317 = shalt.err (!%p1314_p5)
}
 0x36e   : > { %s1392_s7 = smov 128   ;;  %s1393_s12 = smov 8  }
 0x36f   : > { %1122 = dma.vmem_to_hbm [thread:$0]  (%p1525_p10), %s1682_s14, 2048, %s1680_s29, %s783_s16, %s1392_s7, %s1392_s7, %s1393_s12  }
 0x370 PF: > { %s824_s11 = sand.u32 1, %s1360_s21   ;;  %p1759_p9 = scmp.ne.s32.totalorder %s1748_s8, 0 }
 0x371   : > { %p1760_p1 = scmp.ge.s32.totalorder %s1380_s26, 2  ;;  %s825_s24 = scalar_lea.sflag [#allocation4], %s824_s11 }
 0x373   : > { %p1134_p2 = pnand %p1760_p1, %p1759_p9 }
 0x375   : > { %1351 = dma.done.wait (!%p1134_p2), %s825_s24, 16  }
 0x376   : > { %1353 = vsyncadd (!%p1134_p2), %s825_s24, 4294967280  ;;  %s833_s30 = scalar_lea.sflag [#allocation9], %s824_s11 }
 0x377   : > { %1355 = dma.done.wait (!%p1134_p2), %s833_s30, 2048  }
 0x378   : > { %1357 = vsyncadd (!%p1134_p2), %s833_s30, 4294965248  ;;  %s27_s26 = sadd.s32 1, %s1380_s26   ;;  %s1761_s21 = smov %s1364_s22 }
 0x379   : > { %p24_p7 = scmp.ge.s32.totalorder %s27_s26, 4   ;;  %s1762_s22 = smov %s1368_s23 }
 0x37a   : > { %s1763_s23 = smov %s1534_s20  ;;  %s1764_s24 = smov %s1376_s25 }
 0x37b   : > { %s1765_s25 = smov %s1767_s13  ;;  %26 = sbr.rel (!%p24_p7) target bundleno = 11 (0xb), region = 116 }
 0x382   :  { %838 = vsyncpa [#allocation3], 1 }
 0x383   :  { %840 = vsyncpa [#allocation3 + $0x1], 1 }
 0x384   :  { %841 = vsyncpa [#allocation6], 1 }
 0x385   :  { %842 = vsyncpa [#allocation4], 1 }
 0x386   :  { %844 = vsyncpa [#allocation4 + $0x1], 1 }
 0x387   :  { %845 = vsyncpa [#allocation9], 1 }
 0x388   :  { %847 = vsyncpa [#allocation9 + $0x1], 1 }

</bundles_post_ra>
